<compile_context>
chip_gen: v7x
topology: tpu7x:2x2x1
jax: 0.10.0
libtpu: 0.0.40
codegen_flags: <defaults>
</compile_context>

<pallas_src>
import functools

import jax
import jax.numpy as jnp
from jax import lax
from jax.experimental import pallas as pl
from jax.experimental.pallas import tpu as pltpu


def _round_up(x, m):
    return ((x + m - 1) // m) * m


def _sigmoid_via_tanh(x):
    # sigmoid(x) == 0.5 * (tanh(0.5 * x) + 1): one EUP push instead of exp+add+recip.
    return 0.5 * (jnp.tanh(0.5 * x) + 1.0)


def make_lstm_segmenter_kernel(T, B_pad, H):
    """Build the kernel closure with static seq-len / padded-batch / hidden sizes."""

    def kernel(x_ref, w_ih_ref, w_hh_ref, b_ref, w_fc_ref, b_fc_ref, out_ref):
        # x_ref    : (T*B_pad, D)   time-major; rows [t*B_pad:(t+1)*B_pad] = step t
        # w_ih_ref : (D, 4H)        W_ih^T
        # w_hh_ref : (H, 4H)        W_hh^T
        # b_ref    : (1, 4H)        b_ih + b_hh
        # w_fc_ref : (H, OUT_PAD)   W_fc^T zero-padded to 128 lanes
        # b_fc_ref : (1, OUT_PAD)
        # out_ref  : (T*B_pad, OUT_PAD)

        # Hoisted, time-parallel input projection + bias: ONE MXU matmul over all
        # T*B_pad rows instead of T tiny matmuls on the serial critical path.
        xw = (jnp.dot(x_ref[...], w_ih_ref[...],
                      preferred_element_type=jnp.float32)
              + b_ref[...])                                        # (T*B_pad, 4H)

        w_hh = w_hh_ref[...]                                       # hoist the load
        h = jnp.zeros((B_pad, H), jnp.float32)
        c = jnp.zeros((B_pad, H), jnp.float32)
        hs = []                                                    # h_t stays in vregs

        # T is small & static: fully unroll the recurrence.  Per step: one
        # (B_pad,H)x(H,4H) MXU matmul + 3 EUP pushes + VPU elementwise; every
        # slice is statically sublane-aligned (B_pad multiple of 8).
        for t in range(T):
            gates = xw[t * B_pad:(t + 1) * B_pad, :] + jnp.dot(
                h, w_hh, preferred_element_type=jnp.float32)       # (B_pad, 4H)
            # Two EUP pushes over the full 128-lane gates vreg (instead of four
            # 32-lane sigmoid/tanh calls).  PyTorch gate order: [i, f, g, o].
            sig = _sigmoid_via_tanh(gates)
            tnh = jnp.tanh(gates)
            i_g = sig[:, 0 * H:1 * H]
            f_g = sig[:, 1 * H:2 * H]
            g_g = tnh[:, 2 * H:3 * H]
            o_g = sig[:, 3 * H:4 * H]
            c = f_g * c + i_g * g_g
            h = o_g * jnp.tanh(c)
            hs.append(h)

        # All hidden states stay in registers (T*B_pad*H f32 ~ a handful of vregs);
        # no lane-masked VMEM scratch round trip.  One batched fc matmul + a single
        # lane-dense (128-wide) unmasked output store.
        h_all = jnp.concatenate(hs, axis=0)                        # (T*B_pad, H)
        y = (jnp.dot(h_all, w_fc_ref[...],
                     preferred_element_type=jnp.float32)
             + b_fc_ref[...])                                      # (T*B_pad, OUT_PAD)
        out_ref[...] = _sigmoid_via_tanh(y)

    return kernel


def prepare_params(w_ih, w_hh, b_ih, b_hh, w_fc, b_fc):
    """One-time weight prep (transpose / pad).  Call at model init, not per call."""
    H = w_hh.shape[1]
    out_dim = w_fc.shape[0]
    OUT_PAD = _round_up(out_dim, 128)                              # lane-dense output
    w_ih_t = jnp.transpose(w_ih).astype(jnp.float32)               # (D, 4H)
    w_hh_t = jnp.transpose(w_hh).astype(jnp.float32)               # (H, 4H)
    b = (b_ih + b_hh).reshape(1, 4 * H).astype(jnp.float32)        # (1, 4H)
    w_fc_t = jnp.zeros((H, OUT_PAD), jnp.float32).at[:, :out_dim].set(
        jnp.transpose(w_fc))                                       # (H, OUT_PAD)
    b_fc_p = jnp.zeros((1, OUT_PAD), jnp.float32).at[:, :out_dim].set(
        b_fc.reshape(1, out_dim))                                  # (1, OUT_PAD)
    return (w_ih_t, w_hh_t, b, w_fc_t, b_fc_p), out_dim


@functools.partial(jax.jit, static_argnums=(2,))
def lstm_segmenter_pallas(x, params, out_dim):
    """x: (B, T, D) float32 -> (B, T, out_dim) float32 (batch_first).

    The whole apply path (x transpose/pad, pallas_call, output slice/transpose)
    is under one jit so the surrounding small XLA ops fuse.
    """
    w_ih_t, w_hh_t, b, w_fc_t, b_fc_p = params
    B, T, D = x.shape
    H = w_hh_t.shape[0]
    OUT_PAD = w_fc_t.shape[1]
    B_pad = _round_up(B, 8)                                        # sublane-dense batch

    # Time-major + sublane padding: every in-kernel per-step slice is tile aligned.
    x_tb = jnp.transpose(x, (1, 0, 2))                             # (T, B, D)
    x_pad = jnp.zeros((T, B_pad, D), jnp.float32).at[:, :B, :].set(x_tb)
    x_flat = x_pad.reshape(T * B_pad, D)

    kernel = make_lstm_segmenter_kernel(T, B_pad, H)
    vmem_spec = pl.BlockSpec(memory_space=pltpu.MemorySpace.VMEM)

    # Grid-less single invocation: total VMEM footprint is ~100 KB at these shapes.
    # TODO(synk): if T*B grows (especially on v7x's 64 MiB VMEM / 2 TCs), add a
    # batch-parallel grid axis (dimension_semantics=("parallel",...)) and T-chunked
    # BlockSpec pipelining for the xw / fc matmuls.
    out_flat = pl.pallas_call(
        kernel,
        out_shape=jax.ShapeDtypeStruct((T * B_pad, OUT_PAD), jnp.float32),
        in_specs=[vmem_spec] * 6,
        out_specs=vmem_spec,
    )(x_flat, w_ih_t, w_hh_t, b, w_fc_t, b_fc_p)

    # Strip the lane / sublane padding; one transpose back to batch_first.
    out = out_flat.reshape(T, B_pad, OUT_PAD)[:, :B, :out_dim]     # (T, B, out_dim)
    return jnp.transpose(out, (1, 0, 2))                           # (B, T, out_dim)


def lstm_segmenter_ref(x, w_ih, w_hh, b_ih, b_hh, w_fc, b_fc):
    """Pure-JAX reference for torch.nn.LSTM(batch_first=True) + Linear + sigmoid."""
    B, T, D = x.shape
    H = w_hh.shape[1]

    def step(carry, x_t):
        h, c = carry
        gates = x_t @ w_ih.T + h @ w_hh.T + b_ih + b_hh
        i = jax.nn.sigmoid(gates[:, 0 * H:1 * H])
        f = jax.nn.sigmoid(gates[:, 1 * H:2 * H])
        g = jnp.tanh(gates[:, 2 * H:3 * H])
        o = jax.nn.sigmoid(gates[:, 3 * H:4 * H])
        c_new = f * c + i * g
        h_new = o * jnp.tanh(c_new)
        return (h_new, c_new), h_new

    h0 = jnp.zeros((B, H), jnp.float32)
    c0 = jnp.zeros((B, H), jnp.float32)
    _, hs = lax.scan(step, (h0, c0), jnp.transpose(x, (1, 0, 2)))  # (T, B, H)
    out = jnp.transpose(hs, (1, 0, 2)) @ w_fc.T + b_fc
    return jax.nn.sigmoid(out)


if __name__ == "__main__":
    # Small shapes consistent with the module: batch=2, seq=8, input_dim=4, hidden=32, out=1
    B, T, D, H, OUT = 2, 8, 4, 32, 1

    key = jax.random.PRNGKey(0)
    ks = jax.random.split(key, 7)
    scale = 1.0 / jnp.sqrt(H)
    x = jax.random.normal(ks[0], (B, T, D), dtype=jnp.float32)
    w_ih = jax.random.uniform(ks[1], (4 * H, D), jnp.float32, -scale, scale)
    w_hh = jax.random.uniform(ks[2], (4 * H, H), jnp.float32, -scale, scale)
    b_ih = jax.random.uniform(ks[3], (4 * H,), jnp.float32, -scale, scale)
    b_hh = jax.random.uniform(ks[4], (4 * H,), jnp.float32, -scale, scale)
    w_fc = jax.random.uniform(ks[5], (OUT, H), jnp.float32, -scale, scale)
    b_fc = jax.random.uniform(ks[6], (OUT,), jnp.float32, -scale, scale)

    # One-time weight prep (as a real model would do at init), then the jitted apply.
    params, out_dim = prepare_params(w_ih, w_hh, b_ih, b_hh, w_fc, b_fc)
    out = lstm_segmenter_pallas(x, params, out_dim)
    out = jax.block_until_ready(out)

    ref = lstm_segmenter_ref(x, w_ih, w_hh, b_ih, b_hh, w_fc, b_fc)
    assert out.shape == (B, T, OUT), out.shape
    assert jnp.allclose(out, ref, atol=1e-5, rtol=1e-5), float(jnp.max(jnp.abs(out - ref)))

    print("KERNEL_OK")
</pallas_src>

<mosaic_0001>
module attributes {stable_mosaic.version = 11 : i64} {
  func.func @kernel(%arg0: memref<64x4xf32, #tpu.memory_space<vmem>>, %arg1: memref<4x128xf32, #tpu.memory_space<vmem>>, %arg2: memref<32x128xf32, #tpu.memory_space<vmem>>, %arg3: memref<1x128xf32, #tpu.memory_space<vmem>>, %arg4: memref<32x128xf32, #tpu.memory_space<vmem>>, %arg5: memref<1x128xf32, #tpu.memory_space<vmem>>, %arg6: memref<64x128xf32, #tpu.memory_space<vmem>>) attributes {dimension_semantics = [], scalar_prefetch = 0 : i64, scratch_operands = 0 : i64, tpu.core_type = #tpu.core_type<tc>} {
    %c0 = arith.constant 0 : index
    %c0_0 = arith.constant 0 : index
    %0 = vector.load %arg0[%c0, %c0_0] : memref<64x4xf32, #tpu.memory_space<vmem>>, vector<64x4xf32>
    %c0_1 = arith.constant 0 : index
    %c0_2 = arith.constant 0 : index
    %1 = vector.load %arg1[%c0_1, %c0_2] : memref<4x128xf32, #tpu.memory_space<vmem>>, vector<4x128xf32>
    %cst = arith.constant dense<0.000000e+00> : vector<64x128xf32>
    %2 = tpu.matmul %0, %1, %cst {dimension_numbers = #tpu.dot_dimension_numbers<[1], [0], [0], [1], [0, 0, 1, 1], [], []>} : vector<64x4xf32>, vector<4x128xf32>, vector<64x128xf32> -> vector<64x128xf32>
    %c0_3 = arith.constant 0 : index
    %c0_4 = arith.constant 0 : index
    %3 = vector.load %arg3[%c0_3, %c0_4] : memref<1x128xf32, #tpu.memory_space<vmem>>, vector<1x128xf32>
    %4 = vector.broadcast %3 : vector<1x128xf32> to vector<64x128xf32>
    %5 = arith.addf %2, %4 : vector<64x128xf32>
    %c0_5 = arith.constant 0 : index
    %c0_6 = arith.constant 0 : index
    %6 = vector.load %arg2[%c0_5, %c0_6] : memref<32x128xf32, #tpu.memory_space<vmem>>, vector<32x128xf32>
    %cst_7 = arith.constant 0.000000e+00 : f32
    %7 = vector.broadcast %cst_7 : f32 to vector<8x32xf32>
    %cst_8 = arith.constant 0.000000e+00 : f32
    %8 = vector.broadcast %cst_8 : f32 to vector<8x32xf32>
    %9 = vector.extract_strided_slice %5 {offsets = [0, 0], sizes = [8, 128], strides = [1, 1]} : vector<64x128xf32> to vector<8x128xf32>
    %cst_9 = arith.constant dense<0.000000e+00> : vector<8x128xf32>
    %10 = tpu.matmul %7, %6, %cst_9 {dimension_numbers = #tpu.dot_dimension_numbers<[1], [0], [0], [1], [0, 0, 1, 1], [], []>} : vector<8x32xf32>, vector<32x128xf32>, vector<8x128xf32> -> vector<8x128xf32>
    %11 = arith.addf %9, %10 : vector<8x128xf32>
    %cst_10 = arith.constant 5.000000e-01 : f32
    %12 = vector.broadcast %cst_10 : f32 to vector<8x128xf32>
    %13 = arith.mulf %12, %11 : vector<8x128xf32>
    %14 = math.tanh %13 : vector<8x128xf32>
    %cst_11 = arith.constant 1.000000e+00 : f32
    %15 = vector.broadcast %cst_11 : f32 to vector<8x128xf32>
    %16 = arith.addf %14, %15 : vector<8x128xf32>
    %cst_12 = arith.constant 5.000000e-01 : f32
    %17 = vector.broadcast %cst_12 : f32 to vector<8x128xf32>
    %18 = arith.mulf %17, %16 : vector<8x128xf32>
    %19 = math.tanh %11 : vector<8x128xf32>
    %20 = vector.extract_strided_slice %18 {offsets = [0, 0], sizes = [8, 32], strides = [1, 1]} : vector<8x128xf32> to vector<8x32xf32>
    %21 = vector.extract_strided_slice %18 {offsets = [0, 32], sizes = [8, 32], strides = [1, 1]} : vector<8x128xf32> to vector<8x32xf32>
    %22 = vector.extract_strided_slice %19 {offsets = [0, 64], sizes = [8, 32], strides = [1, 1]} : vector<8x128xf32> to vector<8x32xf32>
    %23 = vector.extract_strided_slice %18 {offsets = [0, 96], sizes = [8, 32], strides = [1, 1]} : vector<8x128xf32> to vector<8x32xf32>
    %24 = arith.mulf %21, %8 : vector<8x32xf32>
    %25 = arith.mulf %20, %22 : vector<8x32xf32>
    %26 = arith.addf %24, %25 : vector<8x32xf32>
    %27 = math.tanh %26 : vector<8x32xf32>
    %28 = arith.mulf %23, %27 : vector<8x32xf32>
    %29 = vector.extract_strided_slice %5 {offsets = [8, 0], sizes = [8, 128], strides = [1, 1]} : vector<64x128xf32> to vector<8x128xf32>
    %cst_13 = arith.constant dense<0.000000e+00> : vector<8x128xf32>
    %30 = tpu.matmul %28, %6, %cst_13 {dimension_numbers = #tpu.dot_dimension_numbers<[1], [0], [0], [1], [0, 0, 1, 1], [], []>} : vector<8x32xf32>, vector<32x128xf32>, vector<8x128xf32> -> vector<8x128xf32>
    %31 = arith.addf %29, %30 : vector<8x128xf32>
    %cst_14 = arith.constant 5.000000e-01 : f32
    %32 = vector.broadcast %cst_14 : f32 to vector<8x128xf32>
    %33 = arith.mulf %32, %31 : vector<8x128xf32>
    %34 = math.tanh %33 : vector<8x128xf32>
    %cst_15 = arith.constant 1.000000e+00 : f32
    %35 = vector.broadcast %cst_15 : f32 to vector<8x128xf32>
    %36 = arith.addf %34, %35 : vector<8x128xf32>
    %cst_16 = arith.constant 5.000000e-01 : f32
    %37 = vector.broadcast %cst_16 : f32 to vector<8x128xf32>
    %38 = arith.mulf %37, %36 : vector<8x128xf32>
    %39 = math.tanh %31 : vector<8x128xf32>
    %40 = vector.extract_strided_slice %38 {offsets = [0, 0], sizes = [8, 32], strides = [1, 1]} : vector<8x128xf32> to vector<8x32xf32>
    %41 = vector.extract_strided_slice %38 {offsets = [0, 32], sizes = [8, 32], strides = [1, 1]} : vector<8x128xf32> to vector<8x32xf32>
    %42 = vector.extract_strided_slice %39 {offsets = [0, 64], sizes = [8, 32], strides = [1, 1]} : vector<8x128xf32> to vector<8x32xf32>
    %43 = vector.extract_strided_slice %38 {offsets = [0, 96], sizes = [8, 32], strides = [1, 1]} : vector<8x128xf32> to vector<8x32xf32>
    %44 = arith.mulf %41, %26 : vector<8x32xf32>
    %45 = arith.mulf %40, %42 : vector<8x32xf32>
    %46 = arith.addf %44, %45 : vector<8x32xf32>
    %47 = math.tanh %46 : vector<8x32xf32>
    %48 = arith.mulf %43, %47 : vector<8x32xf32>
    %49 = vector.extract_strided_slice %5 {offsets = [16, 0], sizes = [8, 128], strides = [1, 1]} : vector<64x128xf32> to vector<8x128xf32>
    %cst_17 = arith.constant dense<0.000000e+00> : vector<8x128xf32>
    %50 = tpu.matmul %48, %6, %cst_17 {dimension_numbers = #tpu.dot_dimension_numbers<[1], [0], [0], [1], [0, 0, 1, 1], [], []>} : vector<8x32xf32>, vector<32x128xf32>, vector<8x128xf32> -> vector<8x128xf32>
    %51 = arith.addf %49, %50 : vector<8x128xf32>
    %cst_18 = arith.constant 5.000000e-01 : f32
    %52 = vector.broadcast %cst_18 : f32 to vector<8x128xf32>
    %53 = arith.mulf %52, %51 : vector<8x128xf32>
    %54 = math.tanh %53 : vector<8x128xf32>
    %cst_19 = arith.constant 1.000000e+00 : f32
    %55 = vector.broadcast %cst_19 : f32 to vector<8x128xf32>
    %56 = arith.addf %54, %55 : vector<8x128xf32>
    %cst_20 = arith.constant 5.000000e-01 : f32
    %57 = vector.broadcast %cst_20 : f32 to vector<8x128xf32>
    %58 = arith.mulf %57, %56 : vector<8x128xf32>
    %59 = math.tanh %51 : vector<8x128xf32>
    %60 = vector.extract_strided_slice %58 {offsets = [0, 0], sizes = [8, 32], strides = [1, 1]} : vector<8x128xf32> to vector<8x32xf32>
    %61 = vector.extract_strided_slice %58 {offsets = [0, 32], sizes = [8, 32], strides = [1, 1]} : vector<8x128xf32> to vector<8x32xf32>
    %62 = vector.extract_strided_slice %59 {offsets = [0, 64], sizes = [8, 32], strides = [1, 1]} : vector<8x128xf32> to vector<8x32xf32>
    %63 = vector.extract_strided_slice %58 {offsets = [0, 96], sizes = [8, 32], strides = [1, 1]} : vector<8x128xf32> to vector<8x32xf32>
    %64 = arith.mulf %61, %46 : vector<8x32xf32>
    %65 = arith.mulf %60, %62 : vector<8x32xf32>
    %66 = arith.addf %64, %65 : vector<8x32xf32>
    %67 = math.tanh %66 : vector<8x32xf32>
    %68 = arith.mulf %63, %67 : vector<8x32xf32>
    %69 = vector.extract_strided_slice %5 {offsets = [24, 0], sizes = [8, 128], strides = [1, 1]} : vector<64x128xf32> to vector<8x128xf32>
    %cst_21 = arith.constant dense<0.000000e+00> : vector<8x128xf32>
    %70 = tpu.matmul %68, %6, %cst_21 {dimension_numbers = #tpu.dot_dimension_numbers<[1], [0], [0], [1], [0, 0, 1, 1], [], []>} : vector<8x32xf32>, vector<32x128xf32>, vector<8x128xf32> -> vector<8x128xf32>
    %71 = arith.addf %69, %70 : vector<8x128xf32>
    %cst_22 = arith.constant 5.000000e-01 : f32
    %72 = vector.broadcast %cst_22 : f32 to vector<8x128xf32>
    %73 = arith.mulf %72, %71 : vector<8x128xf32>
    %74 = math.tanh %73 : vector<8x128xf32>
    %cst_23 = arith.constant 1.000000e+00 : f32
    %75 = vector.broadcast %cst_23 : f32 to vector<8x128xf32>
    %76 = arith.addf %74, %75 : vector<8x128xf32>
    %cst_24 = arith.constant 5.000000e-01 : f32
    %77 = vector.broadcast %cst_24 : f32 to vector<8x128xf32>
    %78 = arith.mulf %77, %76 : vector<8x128xf32>
    %79 = math.tanh %71 : vector<8x128xf32>
    %80 = vector.extract_strided_slice %78 {offsets = [0, 0], sizes = [8, 32], strides = [1, 1]} : vector<8x128xf32> to vector<8x32xf32>
    %81 = vector.extract_strided_slice %78 {offsets = [0, 32], sizes = [8, 32], strides = [1, 1]} : vector<8x128xf32> to vector<8x32xf32>
    %82 = vector.extract_strided_slice %79 {offsets = [0, 64], sizes = [8, 32], strides = [1, 1]} : vector<8x128xf32> to vector<8x32xf32>
    %83 = vector.extract_strided_slice %78 {offsets = [0, 96], sizes = [8, 32], strides = [1, 1]} : vector<8x128xf32> to vector<8x32xf32>
    %84 = arith.mulf %81, %66 : vector<8x32xf32>
    %85 = arith.mulf %80, %82 : vector<8x32xf32>
    %86 = arith.addf %84, %85 : vector<8x32xf32>
    %87 = math.tanh %86 : vector<8x32xf32>
    %88 = arith.mulf %83, %87 : vector<8x32xf32>
    %89 = vector.extract_strided_slice %5 {offsets = [32, 0], sizes = [8, 128], strides = [1, 1]} : vector<64x128xf32> to vector<8x128xf32>
    %cst_25 = arith.constant dense<0.000000e+00> : vector<8x128xf32>
    %90 = tpu.matmul %88, %6, %cst_25 {dimension_numbers = #tpu.dot_dimension_numbers<[1], [0], [0], [1], [0, 0, 1, 1], [], []>} : vector<8x32xf32>, vector<32x128xf32>, vector<8x128xf32> -> vector<8x128xf32>
    %91 = arith.addf %89, %90 : vector<8x128xf32>
    %cst_26 = arith.constant 5.000000e-01 : f32
    %92 = vector.broadcast %cst_26 : f32 to vector<8x128xf32>
    %93 = arith.mulf %92, %91 : vector<8x128xf32>
    %94 = math.tanh %93 : vector<8x128xf32>
    %cst_27 = arith.constant 1.000000e+00 : f32
    %95 = vector.broadcast %cst_27 : f32 to vector<8x128xf32>
    %96 = arith.addf %94, %95 : vector<8x128xf32>
    %cst_28 = arith.constant 5.000000e-01 : f32
    %97 = vector.broadcast %cst_28 : f32 to vector<8x128xf32>
    %98 = arith.mulf %97, %96 : vector<8x128xf32>
    %99 = math.tanh %91 : vector<8x128xf32>
    %100 = vector.extract_strided_slice %98 {offsets = [0, 0], sizes = [8, 32], strides = [1, 1]} : vector<8x128xf32> to vector<8x32xf32>
    %101 = vector.extract_strided_slice %98 {offsets = [0, 32], sizes = [8, 32], strides = [1, 1]} : vector<8x128xf32> to vector<8x32xf32>
    %102 = vector.extract_strided_slice %99 {offsets = [0, 64], sizes = [8, 32], strides = [1, 1]} : vector<8x128xf32> to vector<8x32xf32>
    %103 = vector.extract_strided_slice %98 {offsets = [0, 96], sizes = [8, 32], strides = [1, 1]} : vector<8x128xf32> to vector<8x32xf32>
    %104 = arith.mulf %101, %86 : vector<8x32xf32>
    %105 = arith.mulf %100, %102 : vector<8x32xf32>
    %106 = arith.addf %104, %105 : vector<8x32xf32>
    %107 = math.tanh %106 : vector<8x32xf32>
    %108 = arith.mulf %103, %107 : vector<8x32xf32>
    %109 = vector.extract_strided_slice %5 {offsets = [40, 0], sizes = [8, 128], strides = [1, 1]} : vector<64x128xf32> to vector<8x128xf32>
    %cst_29 = arith.constant dense<0.000000e+00> : vector<8x128xf32>
    %110 = tpu.matmul %108, %6, %cst_29 {dimension_numbers = #tpu.dot_dimension_numbers<[1], [0], [0], [1], [0, 0, 1, 1], [], []>} : vector<8x32xf32>, vector<32x128xf32>, vector<8x128xf32> -> vector<8x128xf32>
    %111 = arith.addf %109, %110 : vector<8x128xf32>
    %cst_30 = arith.constant 5.000000e-01 : f32
    %112 = vector.broadcast %cst_30 : f32 to vector<8x128xf32>
    %113 = arith.mulf %112, %111 : vector<8x128xf32>
    %114 = math.tanh %113 : vector<8x128xf32>
    %cst_31 = arith.constant 1.000000e+00 : f32
    %115 = vector.broadcast %cst_31 : f32 to vector<8x128xf32>
    %116 = arith.addf %114, %115 : vector<8x128xf32>
    %cst_32 = arith.constant 5.000000e-01 : f32
    %117 = vector.broadcast %cst_32 : f32 to vector<8x128xf32>
    %118 = arith.mulf %117, %116 : vector<8x128xf32>
    %119 = math.tanh %111 : vector<8x128xf32>
    %120 = vector.extract_strided_slice %118 {offsets = [0, 0], sizes = [8, 32], strides = [1, 1]} : vector<8x128xf32> to vector<8x32xf32>
    %121 = vector.extract_strided_slice %118 {offsets = [0, 32], sizes = [8, 32], strides = [1, 1]} : vector<8x128xf32> to vector<8x32xf32>
    %122 = vector.extract_strided_slice %119 {offsets = [0, 64], sizes = [8, 32], strides = [1, 1]} : vector<8x128xf32> to vector<8x32xf32>
    %123 = vector.extract_strided_slice %118 {offsets = [0, 96], sizes = [8, 32], strides = [1, 1]} : vector<8x128xf32> to vector<8x32xf32>
    %124 = arith.mulf %121, %106 : vector<8x32xf32>
    %125 = arith.mulf %120, %122 : vector<8x32xf32>
    %126 = arith.addf %124, %125 : vector<8x32xf32>
    %127 = math.tanh %126 : vector<8x32xf32>
    %128 = arith.mulf %123, %127 : vector<8x32xf32>
    %129 = vector.extract_strided_slice %5 {offsets = [48, 0], sizes = [8, 128], strides = [1, 1]} : vector<64x128xf32> to vector<8x128xf32>
    %cst_33 = arith.constant dense<0.000000e+00> : vector<8x128xf32>
    %130 = tpu.matmul %128, %6, %cst_33 {dimension_numbers = #tpu.dot_dimension_numbers<[1], [0], [0], [1], [0, 0, 1, 1], [], []>} : vector<8x32xf32>, vector<32x128xf32>, vector<8x128xf32> -> vector<8x128xf32>
    %131 = arith.addf %129, %130 : vector<8x128xf32>
    %cst_34 = arith.constant 5.000000e-01 : f32
    %132 = vector.broadcast %cst_34 : f32 to vector<8x128xf32>
    %133 = arith.mulf %132, %131 : vector<8x128xf32>
    %134 = math.tanh %133 : vector<8x128xf32>
    %cst_35 = arith.constant 1.000000e+00 : f32
    %135 = vector.broadcast %cst_35 : f32 to vector<8x128xf32>
    %136 = arith.addf %134, %135 : vector<8x128xf32>
    %cst_36 = arith.constant 5.000000e-01 : f32
    %137 = vector.broadcast %cst_36 : f32 to vector<8x128xf32>
    %138 = arith.mulf %137, %136 : vector<8x128xf32>
    %139 = math.tanh %131 : vector<8x128xf32>
    %140 = vector.extract_strided_slice %138 {offsets = [0, 0], sizes = [8, 32], strides = [1, 1]} : vector<8x128xf32> to vector<8x32xf32>
    %141 = vector.extract_strided_slice %138 {offsets = [0, 32], sizes = [8, 32], strides = [1, 1]} : vector<8x128xf32> to vector<8x32xf32>
    %142 = vector.extract_strided_slice %139 {offsets = [0, 64], sizes = [8, 32], strides = [1, 1]} : vector<8x128xf32> to vector<8x32xf32>
    %143 = vector.extract_strided_slice %138 {offsets = [0, 96], sizes = [8, 32], strides = [1, 1]} : vector<8x128xf32> to vector<8x32xf32>
    %144 = arith.mulf %141, %126 : vector<8x32xf32>
    %145 = arith.mulf %140, %142 : vector<8x32xf32>
    %146 = arith.addf %144, %145 : vector<8x32xf32>
    %147 = math.tanh %146 : vector<8x32xf32>
    %148 = arith.mulf %143, %147 : vector<8x32xf32>
    %149 = vector.extract_strided_slice %5 {offsets = [56, 0], sizes = [8, 128], strides = [1, 1]} : vector<64x128xf32> to vector<8x128xf32>
    %cst_37 = arith.constant dense<0.000000e+00> : vector<8x128xf32>
    %150 = tpu.matmul %148, %6, %cst_37 {dimension_numbers = #tpu.dot_dimension_numbers<[1], [0], [0], [1], [0, 0, 1, 1], [], []>} : vector<8x32xf32>, vector<32x128xf32>, vector<8x128xf32> -> vector<8x128xf32>
    %151 = arith.addf %149, %150 : vector<8x128xf32>
    %cst_38 = arith.constant 5.000000e-01 : f32
    %152 = vector.broadcast %cst_38 : f32 to vector<8x128xf32>
    %153 = arith.mulf %152, %151 : vector<8x128xf32>
    %154 = math.tanh %153 : vector<8x128xf32>
    %cst_39 = arith.constant 1.000000e+00 : f32
    %155 = vector.broadcast %cst_39 : f32 to vector<8x128xf32>
    %156 = arith.addf %154, %155 : vector<8x128xf32>
    %cst_40 = arith.constant 5.000000e-01 : f32
    %157 = vector.broadcast %cst_40 : f32 to vector<8x128xf32>
    %158 = arith.mulf %157, %156 : vector<8x128xf32>
    %159 = math.tanh %151 : vector<8x128xf32>
    %160 = vector.extract_strided_slice %158 {offsets = [0, 0], sizes = [8, 32], strides = [1, 1]} : vector<8x128xf32> to vector<8x32xf32>
    %161 = vector.extract_strided_slice %158 {offsets = [0, 32], sizes = [8, 32], strides = [1, 1]} : vector<8x128xf32> to vector<8x32xf32>
    %162 = vector.extract_strided_slice %159 {offsets = [0, 64], sizes = [8, 32], strides = [1, 1]} : vector<8x128xf32> to vector<8x32xf32>
    %163 = vector.extract_strided_slice %158 {offsets = [0, 96], sizes = [8, 32], strides = [1, 1]} : vector<8x128xf32> to vector<8x32xf32>
    %164 = arith.mulf %161, %146 : vector<8x32xf32>
    %165 = arith.mulf %160, %162 : vector<8x32xf32>
    %166 = arith.addf %164, %165 : vector<8x32xf32>
    %167 = math.tanh %166 : vector<8x32xf32>
    %168 = arith.mulf %163, %167 : vector<8x32xf32>
    %169 = tpu.concatenate %28, %48, %68, %88, %108, %128, %148, %168 in 0 : vector<8x32xf32>, vector<8x32xf32>, vector<8x32xf32>, vector<8x32xf32>, vector<8x32xf32>, vector<8x32xf32>, vector<8x32xf32>, vector<8x32xf32> -> vector<64x32xf32>
    %c0_41 = arith.constant 0 : index
    %c0_42 = arith.constant 0 : index
    %170 = vector.load %arg4[%c0_41, %c0_42] : memref<32x128xf32, #tpu.memory_space<vmem>>, vector<32x128xf32>
    %cst_43 = arith.constant dense<0.000000e+00> : vector<64x128xf32>
    %171 = tpu.matmul %169, %170, %cst_43 {dimension_numbers = #tpu.dot_dimension_numbers<[1], [0], [0], [1], [0, 0, 1, 1], [], []>} : vector<64x32xf32>, vector<32x128xf32>, vector<64x128xf32> -> vector<64x128xf32>
    %c0_44 = arith.constant 0 : index
    %c0_45 = arith.constant 0 : index
    %172 = vector.load %arg5[%c0_44, %c0_45] : memref<1x128xf32, #tpu.memory_space<vmem>>, vector<1x128xf32>
    %173 = vector.broadcast %172 : vector<1x128xf32> to vector<64x128xf32>
    %174 = arith.addf %171, %173 : vector<64x128xf32>
    %cst_46 = arith.constant 5.000000e-01 : f32
    %175 = vector.broadcast %cst_46 : f32 to vector<64x128xf32>
    %176 = arith.mulf %175, %174 : vector<64x128xf32>
    %177 = math.tanh %176 : vector<64x128xf32>
    %cst_47 = arith.constant 1.000000e+00 : f32
    %178 = vector.broadcast %cst_47 : f32 to vector<64x128xf32>
    %179 = arith.addf %177, %178 : vector<64x128xf32>
    %cst_48 = arith.constant 5.000000e-01 : f32
    %180 = vector.broadcast %cst_48 : f32 to vector<64x128xf32>
    %181 = arith.mulf %180, %179 : vector<64x128xf32>
    %c0_49 = arith.constant 0 : index
    %c0_50 = arith.constant 0 : index
    %182 = vector.load %arg6[%c0_49, %c0_50] : memref<64x128xf32, #tpu.memory_space<vmem>>, vector<64x128xf32>
    tpu.vector_store %arg6[%c0_49, %c0_50], %181 {strides = array<i32>} : memref<64x128xf32, #tpu.memory_space<vmem>>, vector<64x128xf32>,
    return
  }
}

</mosaic_0001>

<bundles_post_ra>
// kernel: lstm_segmenter_pallas.1
= control target key start
LH: loop header
LB: loop body
LE: loop exit
PB: predicated region body
PF: predicated region fallthrough
CT: control target
= control target key end

     0   :  { %vm64_vm0 = vcmask 1043456   ;;  %vm39_vm1 = vcmask 31744   ;;  %v1461_v8 = vmov 0.0|0.0   ;;  %vm1462_vm2 = vmmov 0   ;;  %s1464_s19 = smov 64   ;;  %s1746_s1 = inlined_call_operand.vmem [shape: f32[4,128], index: 1, kind: input, shape index: {}]   ;;  %s1747_s0 = inlined_call_operand.vmem [shape: f32[64,4], index: 0, kind: input, shape index: {}]   ;;  %s1748_s2 = inlined_call_operand.vmem [shape: f32[32,128], index: 2, kind: input, shape index: {}]   ;;  %s1749_s3 = inlined_call_operand.vmem [shape: f32[1,128], index: 3, kind: input, shape index: {}]   ;;  %s1750_s4 = inlined_call_operand.vmem [shape: f32[32,128], index: 4, kind: input, shape index: {}]   ;;  %s1751_s5 = inlined_call_operand.vmem [shape: f32[1,128], index: 5, kind: input, shape index: {}]   ;;  %s1752_s6 = inlined_call_operand.vmem [shape: f32[64,128], index: 6, kind: output, shape index: {}]  }
   0x1   :  { %v31_v0 = vld [vmem:[%s1746_s1] sm:$0xf]  ;;  %v28_v2 = vld [vmem:[%s1747_s0 + $0x28] sm:$0xff]  ;;  %v29_v5 = vld [vmem:[%s1747_s0 + $0x30] sm:$0xff]  ;;  %v1463_v14 = vmov 0.0   ;;  %vm177_vm3 = vcmask 261120  }
   0x2   :  { %v27_v1 = vld [vmem:[%s1747_s0 + $0x20] sm:$0xff]  ;;  %1390 = vmatprep.subr.msk.mxu1 %vm64_vm0, %v31_v0  ;;  %v174_v4 = vld [vmem:[%s1748_s2 + $0x8] sm:$0xff]  ;;  %1212 = vmatprep.subr.msk.mxu0 %vm64_vm0, %v31_v0  ;;  %v175_v10 = vld [vmem:[%s1748_s2 + $0x10] sm:$0xff] }
   0x3   :  { %1220 = vmatprep.mubr.msk.f32.mxu1 %vm39_vm1, %v27_v1  ;;  %v173_v3 = vld [vmem:[%s1748_s2] sm:$0xff]  ;;  %1391 = vmatpush3.msk.msra.mxu1 %vm64_vm0, %v31_v0  ;;  %v24_v9 = vld [vmem:[%s1747_s0 + $0x8] sm:$0xff]  ;;  %v176_v11 = vld [vmem:[%s1748_s2 + $0x18] sm:$0xff] }
   0x4   :  { %v1522_v6 = vpack.c.bf16 %v174_v4, %v173_v3  ;;  %v23_v7 = vld [vmem:[%s1747_s0] sm:$0xff]  ;;  %1221 = vmatmul.mubr.msk.f32.vlgmr.msra.gmra.mrb[0].mxu1 %vm39_vm1, %v28_v2  ;;  %1334 = vmatprep.subr.bf16.mxu1 %v1461_v8  ;;  %v30_v12 = vld [vmem:[%s1747_s0 + $0x38] sm:$0xff]  ;;  %v1544_v13 = vpack.c.bf16 %v176_v11, %v175_v10  ;;  %v25_v54 = vld [vmem:[%s1747_s0 + $0x10] sm:$0xff] }
   0x5   :  { %1223 = vmatprep.mubr.msk.f32.mxu1 %vm39_vm1, %v29_v5  ;;  %1213 = vmatpush3.msk.msra.mxu0 %vm64_vm0, %v31_v0  ;;  %v1574_v18 = vld [vmem:[%s1749_s3] ss:$0 sm:$0xff]  ;;  %s1465_s3 = smov 32   ;;  %v26_v55 = vld [vmem:[%s1747_s0 + $0x18] sm:$0xff] }
   0x6   :  { %1336 = vmatpush3.bf16.msra.mxu1 %v1522_v6  ;;  %1214 = vmatprep.mubr.msk.f32.mxu0 %vm39_vm1, %v23_v7 }
   0x7   :  { %1337 = vmatprep.subr.bf16.mxu1 %v1461_v8  ;;  %1215 = vmatmul.mubr.msk.f32.vlgmr.msra.gmra.mrb[0].mxu0 %vm39_vm1, %v24_v9 }
   0x8   :  { %1224 = vmatmul.mubr.msk.f32.gmra.mrb[2].mxu1 %vm39_vm1, %v30_v12  ;;  %1346 = vmatprep.subr.bf16.mxu0 %v1461_v8 }
   0x9   :  { %1234 = vmatprep.mubr.msk.f32.mxu1 %vm1462_vm2, %v1463_v14  ;;  %1348 = vmatpush3.bf16.msra.mxu0 %v1522_v6 }
   0xa   :  { %1339 = vmatpush3.bf16.msra.mxu1 %v1544_v13  ;;  %1349 = vmatprep.subr.bf16.mxu0 %v1461_v8 }
   0xb   :  { %1340 = vmatprep.subr.bf16.mxu1 %v1461_v8  ;;  %1217 = vmatprep.mubr.msk.f32.mxu0 %vm39_vm1, %v25_v54 }
   0xc   :  { %1218 = vmatmul.mubr.msk.f32.gmra.mrb[2].mxu0 %vm39_vm1, %v26_v55 }
   0xd   :  { %1235 = vmatmul.mubr.f32.vlgmr.msra.gmra.mrb[4].mxu1 %v1463_v14  ;;  %1351 = vmatpush3.bf16.msra.mxu0 %v1544_v13 }
   0xe   :  { %1342 = vmatpush3.bf16.msra.mxu1 %v1522_v6  ;;  %1245 = vmatprep.mubr.msk.f32.mxu1 %vm1462_vm2, %v1463_v14 }
   0xf   :  { %1343 = vmatprep.subr.bf16.mxu1 %v1461_v8  ;;  %1358 = vmatprep.subr.bf16.mxu0 %v1461_v8 }
  0x10   :  { %1256 = vmatprep.mubr.msk.f32.mxu0 %vm1462_vm2, %v1463_v14 }
  0x12   :  { %1345 = vmatpush3.bf16.msra.mxu1 %v1544_v13 }
  0x13   :  { %1352 = vmatprep.subr.bf16.mxu1 %v1461_v8 }
  0xd7   :  { %v1567_v15 = vpop.f32.mrb[0].mxu1 }
  0xd8   :  { %v1569_v16 = vpop.f32.mrb[1].mxu1 }
  0xda   :  { %v1216_v17 = vpop.f32.mrb[0].mxu0 }
  0xdb   :  { %v1576_v19 = vpop.f32.mrb[2].mxu1  ;;  %v134_v20 = vpop.f32.mrb[1].mxu0  ;;  %v140_v40 = vadd.f32 %v1216_v17, %v1574_v18 }
  0xdc   :  { %v1578_v21 = vpop.f32.mrb[3].mxu1  ;;  %v135_v22 = vadd.f32 %v1574_v18, %v134_v20 }
  0xdf   :  { %v1219_v59 = vpop.f32.mrb[2].mxu0 }
  0xe0   :  { %v247_v23 = vpop.f32.mrb[4].mxu1  ;;  %v144_v60 = vpop.f32.mrb[3].mxu0 }
  0xe1   :  { %v251_v24 = vadd.f32 %v247_v23, %v135_v22  ;;  %v1236_v25 = vpop.f32.mrb[5].mxu1  ;;  %v145_v62 = vadd.f32 %v1574_v18, %v144_v60 }
  0xe2   :  { %v150_v25 = vadd.f32 %v1219_v59, %v1574_v18 }
  0xe3   :  { %1397 = vtanh.f32 %v251_v24  ;;  %v252_v27 = vmul.f32 0.5, %v251_v24 }
  0xe5   :  { %1399 = vtanh.f32 %v252_v27 }
  0xed   :  { %v1398_v26 = vpop.eup %1397 }
  0xee   :  { %259 = vrot.lane.b32.xlu0 %v1398_v26, %s1464_s19 }
  0xef   :  { %v1400_v28 = vpop.eup %1399 }
  0xf0   :  { %v254_v29 = vadd.f32 1.0, %v1400_v28 }
  0xf2   :  { %v255_v30 = vmul.f32 0.5, %v254_v29 }
  0xf4   :  { %v257_v33 = vmul.f32 0.0, %v255_v30 }
 0x160   :  { %v260_v31 = vpop.permute.xlu0 %259 }
 0x161   :  { %v262_v32 = vmul.f32 %v260_v31, %v255_v30 }
 0x163   :  { %264 = vrot.lane.b32.xlu0 %v262_v32, %s1465_s3 }
 0x1d5   :  { %v265_v34 = vpop.permute.xlu0 %264 }
 0x1d6   :  { %v267_v35 = vadd.f32 %v265_v34, %v257_v33 }
 0x1d8   :  { %1401 = vtanh.f32 %v267_v35 }
 0x1e2   :  { %v1402_v36 = vpop.eup %1401 }
 0x1e3   :  { %270 = vrot.lane.b32.xlu1 %v1402_v36, %s1464_s19 }
 0x255   :  { %v271_v37 = vpop.permute.xlu1 %270 }
 0x256   :  { %v273_v38 = vmul.f32 %v271_v37, %v255_v30 }
 0x258   :  { %275 = vrot.lane.b32.xlu1 %v273_v38, %s1465_s3 }
 0x2ca   :  { %v1585_v39 = vpop.permute.xlu1 %275 }
 0x2cb   :  { %1246 = vmatmul.mubr.msk.f32.vlgmr.msra.gmra.mrb[6].mxu1 %vm177_vm3, %v1585_v39 }
 0x2cc   :  { %1354 = vmatpush3.bf16.msra.mxu1 %v1522_v6  ;;  %1267 = vmatprep.mubr.msk.f32.mxu1 %vm1462_vm2, %v1463_v14 }
 0x2cd   :  { %1355 = vmatprep.subr.bf16.mxu1 %v1461_v8 }
 0x2d0   :  { %1357 = vmatpush3.bf16.msra.mxu1 %v1544_v13 }
 0x2d1   :  { %1364 = vmatprep.subr.bf16.mxu1 %v1461_v8 }
 0x39e   :  { %v345_v41 = vpop.f32.mrb[6].mxu1 }
 0x39f   :  { %v349_v42 = vadd.f32 %v345_v41, %v140_v40  ;;  %v1247_v43 = vpop.f32.mrb[7].mxu1 }
 0x3a1   :  { %1403 = vtanh.f32 %v349_v42  ;;  %v350_v45 = vmul.f32 0.5, %v349_v42 }
 0x3a3   :  { %1405 = vtanh.f32 %v350_v45 }
 0x3ab   :  { %v1404_v44 = vpop.eup %1403 }
 0x3ac   :  { %357 = vrot.lane.b32.xlu0 %v1404_v44, %s1464_s19  ;;  %v155_v44 = vadd.f32 %v1574_v18, %v1569_v16 }
 0x3ad   :  { %v1406_v46 = vpop.eup %1405 }
 0x3ae   :  { %v352_v47 = vadd.f32 1.0, %v1406_v46 }
 0x3b0   :  { %v353_v48 = vmul.f32 0.5, %v352_v47 }
 0x3b2   :  { %v355_v51 = vmul.f32 %v353_v48, %v267_v35 }
 0x41e   :  { %v358_v49 = vpop.permute.xlu0 %357 }
 0x41f   :  { %v360_v50 = vmul.f32 %v358_v49, %v353_v48 }
 0x421   :  { %362 = vrot.lane.b32.xlu1 %v360_v50, %s1465_s3 }
 0x493   :  { %v363_v52 = vpop.permute.xlu1 %362 }
 0x494   :  { %v365_v53 = vadd.f32 %v363_v52, %v355_v51 }
 0x496   :  { %1407 = vtanh.f32 %v365_v53 }
 0x4a0   :  { %v1408_v56 = vpop.eup %1407 }
 0x4a1   :  { %368 = vrot.lane.b32.xlu0 %v1408_v56, %s1464_s19 }
 0x513   :  { %v369_v57 = vpop.permute.xlu0 %368 }
 0x514   :  { %v371_v58 = vmul.f32 %v369_v57, %v353_v48 }
 0x516   :  { %373 = vrot.lane.b32.xlu1 %v371_v58, %s1465_s3 }
 0x588   :  { %v1610_v61 = vpop.permute.xlu1 %373 }
 0x589   :  { %1257 = vmatmul.mubr.msk.f32.vlgmr.msra.gmra.mrb[4].mxu0 %vm177_vm3, %v1610_v61 }
 0x58a   :  { %1360 = vmatpush3.bf16.msra.mxu0 %v1522_v6  ;;  %1278 = vmatprep.mubr.msk.f32.mxu0 %vm1462_vm2, %v1463_v14 }
 0x58b   :  { %1361 = vmatprep.subr.bf16.mxu0 %v1461_v8 }
 0x58e   :  { %1363 = vmatpush3.bf16.msra.mxu0 %v1544_v13 }
 0x58f   :  { %1370 = vmatprep.subr.bf16.mxu0 %v1461_v8 }
 0x65c   :  { %v443_v63 = vpop.f32.mrb[4].mxu0 }
 0x65d   :  { %v447_v0 = vadd.f32 %v443_v63, %v145_v62  ;;  %v1258_v1 = vpop.f32.mrb[5].mxu0  ;;  %v160_v62 = vadd.f32 %v1567_v15, %v1574_v18  ;;  %v960_v15 = vld [vmem:[%s1750_s4] sm:$0xff] }
 0x65f   :  { %1409 = vtanh.f32 %v447_v0  ;;  %v448_v3 = vmul.f32 0.5, %v447_v0 }
 0x661   :  { %1411 = vtanh.f32 %v448_v3 }
 0x669   :  { %v1410_v2 = vpop.eup %1409 }
 0x66a   :  { %455 = vrot.lane.b32.xlu0 %v1410_v2, %s1464_s19 }
 0x66b   :  { %v1412_v4 = vpop.eup %1411 }
 0x66c   :  { %v450_v5 = vadd.f32 1.0, %v1412_v4 }
 0x66e   :  { %v451_v7 = vmul.f32 0.5, %v450_v5 }
 0x670   :  { %v453_v11 = vmul.f32 %v451_v7, %v365_v53 }
 0x6dc   :  { %v456_v9 = vpop.permute.xlu0 %455 }
 0x6dd   :  { %v458_v10 = vmul.f32 %v456_v9, %v451_v7 }
 0x6df   :  { %460 = vrot.lane.b32.xlu1 %v458_v10, %s1465_s3  ;;  %v961_v10 = vld [vmem:[%s1750_s4 + $0x8] sm:$0xff] }
 0x751   :  { %v461_v12 = vpop.permute.xlu1 %460 }
 0x752   :  { %v463_v17 = vadd.f32 %v461_v12, %v453_v11  ;;  %v1382_v11 = vpack.c.bf16 %v961_v10, %v960_v15 }
 0x754   :  { %1413 = vtanh.f32 %v463_v17 }
 0x75e   :  { %v1414_v20 = vpop.eup %1413 }
 0x75f   :  { %466 = vrot.lane.b32.xlu0 %v1414_v20, %s1464_s19 }
 0x7d1   :  { %v467_v22 = vpop.permute.xlu0 %466 }
 0x7d2   :  { %v469_v23 = vmul.f32 %v467_v22, %v451_v7  ;;  %v962_v22 = vld [vmem:[%s1750_s4 + $0x10] sm:$0xff] }
 0x7d4   :  { %471 = vrot.lane.b32.xlu1 %v469_v23, %s1465_s3  ;;  %v963_v23 = vld [vmem:[%s1750_s4 + $0x18] sm:$0xff] }
 0x846   :  { %v1625_v24 = vpop.permute.xlu1 %471 }
 0x847   :  { %1268 = vmatmul.mubr.msk.f32.vlgmr.msra.gmra.mrb[8].mxu1 %vm177_vm3, %v1625_v24 }
 0x848   :  { %1366 = vmatpush3.bf16.msra.mxu1 %v1522_v6  ;;  %1289 = vmatprep.mubr.msk.f32.mxu1 %vm1462_vm2, %v1463_v14 }
 0x849   :  { %1367 = vmatprep.subr.bf16.mxu1 %v1461_v8 }
 0x84c   :  { %1369 = vmatpush3.bf16.msra.mxu1 %v1544_v13 }
 0x84d   :  { %1376 = vmatprep.subr.bf16.mxu1 %v1461_v8 }
 0x91a   :  { %v541_v26 = vpop.f32.mrb[8].mxu1 }
 0x91b   :  { %v545_v27 = vadd.f32 %v541_v26, %v150_v25  ;;  %v1269_v28 = vpop.f32.mrb[9].mxu1  ;;  %v1386_v25 = vpack.c.bf16 %v963_v23, %v962_v22 }
 0x91d   :  { %1415 = vtanh.f32 %v545_v27  ;;  %v546_v30 = vmul.f32 0.5, %v545_v27  ;;  %v165_v27 = vadd.f32 %v1574_v18, %v1578_v21 }
 0x91f   :  { %1417 = vtanh.f32 %v546_v30 }
 0x927   :  { %v1416_v29 = vpop.eup %1415 }
 0x928   :  { %553 = vrot.lane.b32.xlu0 %v1416_v29, %s1464_s19 }
 0x929   :  { %v1418_v31 = vpop.eup %1417 }
 0x92a   :  { %v548_v32 = vadd.f32 1.0, %v1418_v31 }
 0x92c   :  { %v549_v33 = vmul.f32 0.5, %v548_v32 }
 0x92e   :  { %v551_v36 = vmul.f32 %v549_v33, %v463_v17 }
 0x99a   :  { %v554_v34 = vpop.permute.xlu0 %553 }
 0x99b   :  { %v556_v35 = vmul.f32 %v554_v34, %v549_v33 }
 0x99d   :  { %558 = vrot.lane.b32.xlu1 %v556_v35, %s1465_s3 }
 0xa0f   :  { %v559_v37 = vpop.permute.xlu1 %558 }
 0xa10   :  { %v561_v38 = vadd.f32 %v559_v37, %v551_v36 }
 0xa12   :  { %1419 = vtanh.f32 %v561_v38 }
 0xa1c   :  { %v1420_v40 = vpop.eup %1419 }
 0xa1d   :  { %564 = vrot.lane.b32.xlu0 %v1420_v40, %s1464_s19 }
 0xa8f   :  { %v565_v41 = vpop.permute.xlu0 %564 }
 0xa90   :  { %v567_v42 = vmul.f32 %v565_v41, %v549_v33 }
 0xa92   :  { %569 = vrot.lane.b32.xlu1 %v567_v42, %s1465_s3 }
 0xb04   :  { %v1640_v43 = vpop.permute.xlu1 %569 }
 0xb05   :  { %1279 = vmatmul.mubr.msk.f32.vlgmr.msra.gmra.mrb[6].mxu0 %vm177_vm3, %v1640_v43 }
 0xb06   :  { %1372 = vmatpush3.bf16.msra.mxu0 %v1522_v6  ;;  %1300 = vmatprep.mubr.msk.f32.mxu0 %vm1462_vm2, %v1463_v14 }
 0xb07   :  { %1373 = vmatprep.subr.bf16.mxu0 %v1461_v8 }
 0xb0a   :  { %1375 = vmatpush3.bf16.msra.mxu0 %v1544_v13 }
 0xb0b   :  { %1383 = vmatprep.subr.bf16.mxu0 %v1382_v11 }
 0xbd8   :  { %v639_v45 = vpop.f32.mrb[6].mxu0 }
 0xbd9   :  { %v643_v46 = vadd.f32 %v639_v45, %v155_v44  ;;  %v1280_v47 = vpop.f32.mrb[7].mxu0 }
 0xbdb   :  { %1421 = vtanh.f32 %v643_v46  ;;  %v644_v49 = vmul.f32 0.5, %v643_v46 }
 0xbdd   :  { %1423 = vtanh.f32 %v644_v49 }
 0xbe5   :  { %v1422_v48 = vpop.eup %1421 }
 0xbe6   :  { %651 = vrot.lane.b32.xlu0 %v1422_v48, %s1464_s19 }
 0xbe7   :  { %v1424_v50 = vpop.eup %1423 }
 0xbe8   :  { %v646_v51 = vadd.f32 1.0, %v1424_v50 }
 0xbea   :  { %v647_v52 = vmul.f32 0.5, %v646_v51 }
 0xbec   :  { %v649_v55 = vmul.f32 %v647_v52, %v561_v38 }
 0xc58   :  { %v652_v53 = vpop.permute.xlu0 %651 }
 0xc59   :  { %v654_v54 = vmul.f32 %v652_v53, %v647_v52 }
 0xc5b   :  { %656 = vrot.lane.b32.xlu1 %v654_v54, %s1465_s3 }
 0xccd   :  { %v657_v56 = vpop.permute.xlu1 %656 }
 0xcce   :  { %v659_v57 = vadd.f32 %v657_v56, %v649_v55 }
 0xcd0   :  { %1425 = vtanh.f32 %v659_v57 }
 0xcda   :  { %v1426_v16 = vpop.eup %1425 }
 0xcdb   :  { %662 = vrot.lane.b32.xlu0 %v1426_v16, %s1464_s19 }
 0xd4d   :  { %v663_v58 = vpop.permute.xlu0 %662 }
 0xd4e   :  { %v665_v59 = vmul.f32 %v663_v58, %v647_v52 }
 0xd50   :  { %667 = vrot.lane.b32.xlu1 %v665_v59, %s1465_s3 }
 0xdc2   :  { %v668_v60 = vpop.permute.xlu1 %667 }
 0xdc3   :  { %1290 = vmatmul.mubr.msk.f32.vlgmr.msra.gmra.mrb[10].mxu1 %vm177_vm3, %v668_v60 }
 0xdc4   :  { %1378 = vmatpush3.bf16.msra.mxu1 %v1522_v6  ;;  %1311 = vmatprep.mubr.msk.f32.mxu1 %vm1462_vm2, %v1463_v14 }
 0xdc5   :  { %1379 = vmatprep.subr.bf16.mxu1 %v1461_v8 }
 0xdc8   :  { %1381 = vmatpush3.bf16.msra.mxu1 %v1544_v13 }
 0xe96   :  { %v737_v63 = vpop.f32.mrb[10].mxu1 }
 0xe97   :  { %v741_v0 = vadd.f32 %v737_v63, %v160_v62  ;;  %v1291_v1 = vpop.f32.mrb[11].mxu1 }
 0xe99   :  { %1427 = vtanh.f32 %v741_v0  ;;  %v742_v3 = vmul.f32 0.5, %v741_v0 }
 0xe9b   :  { %1429 = vtanh.f32 %v742_v3 }
 0xea3   :  { %v1428_v2 = vpop.eup %1427 }
 0xea4   :  { %749 = vrot.lane.b32.xlu0 %v1428_v2, %s1464_s19 }
 0xea5   :  { %v1430_v6 = vpop.eup %1429 }
 0xea6   :  { %v744_v4 = vadd.f32 1.0, %v1430_v6 }
 0xea8   :  { %v745_v5 = vmul.f32 0.5, %v744_v4 }
 0xeaa   :  { %v747_v8 = vmul.f32 %v745_v5, %v659_v57 }
 0xf16   :  { %v750_v14 = vpop.permute.xlu0 %749 }
 0xf17   :  { %v752_v7 = vmul.f32 %v750_v14, %v745_v5 }
 0xf19   :  { %754 = vrot.lane.b32.xlu1 %v752_v7, %s1465_s3 }
 0xf8b   :  { %v755_v13 = vpop.permute.xlu1 %754 }
 0xf8c   :  { %v1665_v9 = vadd.f32 %v755_v13, %v747_v8 }
 0xf8e   :  { %1431 = vtanh.f32 %v1665_v9 }
 0xf98   :  { %v1432_v12 = vpop.eup %1431 }
 0xf99   :  { %760 = vrot.lane.b32.xlu0 %v1432_v12, %s1464_s19 }
0x100b   :  { %v761_v17 = vpop.permute.xlu0 %760 }
0x100c   :  { %v763_v20 = vmul.f32 %v761_v17, %v745_v5  ;;  %v170_v17 = vadd.f32 %v1576_v19, %v1574_v18 }
0x100e   :  { %765 = vrot.lane.b32.xlu1 %v763_v20, %s1465_s3 }
0x1080   :  { %v766_v26 = vpop.permute.xlu1 %765 }
0x1081   :  { %1301 = vmatmul.mubr.msk.f32.vlgmr.msra.gmra.mrb[8].mxu0 %vm177_vm3, %v766_v26 }
0x1082   :  { %1385 = vmatpush3.bf16.msra.mxu0 %v1382_v11  ;;  %1322 = vmatprep.mubr.msk.f32.mxu0 %vm177_vm3, %v1585_v39 }
0x1083   :  { %1387 = vmatprep.subr.bf16.mxu0 %v1386_v25 }
0x1086   :  { %1389 = vmatpush3.bf16.msra.mxu0 %v1386_v25 }
0x1089   :  { %1323 = vmatmul.mubr.msk.f32.vlgmr.msra.gmra.mrb[10].mxu0 %vm177_vm3, %v1610_v61  ;;  %v1698_v61 = vld [vmem:[%s1751_s5] ss:$0 sm:$0xff] }
0x108a   :  { %1325 = vmatprep.mubr.msk.f32.mxu0 %vm177_vm3, %v1625_v24 }
0x108d   :  { %1326 = vmatmul.mubr.msk.f32.gmra.mrb[12].mxu0 %vm177_vm3, %v1640_v43 }
0x108e   :  { %1328 = vmatprep.mubr.msk.f32.mxu0 %vm177_vm3, %v668_v60 }
0x1091   :  { %1329 = vmatmul.mubr.msk.f32.gmra.mrb[14].mxu0 %vm177_vm3, %v766_v26 }
0x1154   :  { %v835_v28 = vpop.f32.mrb[8].mxu0 }
0x1155   :  { %v839_v39 = vadd.f32 %v835_v28, %v165_v27  ;;  %v1302_v29 = vpop.f32.mrb[9].mxu0 }
0x1157   :  { %1433 = vtanh.f32 %v839_v39  ;;  %v840_v2 = vmul.f32 0.5, %v839_v39 }
0x115c   :  { %v1324_v24 = vpop.f32.mrb[10].mxu0 }
0x115d   :  { %v1048_v30 = vadd.f32 %v1324_v24, %v1698_v61  ;;  %v1042_v31 = vpop.f32.mrb[11].mxu0 }
0x115e   :  { %v1043_v32 = vadd.f32 %v1698_v61, %v1042_v31 }
0x115f   :  { %v1082_v33 = vmul.f32 0.5, %v1048_v30 }
0x1160   :  { %v1081_v34 = vmul.f32 0.5, %v1043_v32  ;;  %v1327_v35 = vpop.f32.mrb[12].mxu0 }
0x1161   :  { %v1434_v36 = vpop.eup %1433  ;;  %1435 = vtanh.f32 %v1082_v33  ;;  %v1058_v21 = vadd.f32 %v1327_v35, %v1698_v61  ;;  %v1052_v37 = vpop.f32.mrb[13].mxu0 }
0x1162   :  { %1437 = vtanh.f32 %v1081_v34  ;;  %v1053_v38 = vadd.f32 %v1698_v61, %v1052_v37  ;;  %847 = vrot.lane.b32.xlu0 %v1434_v36, %s1464_s19 }
0x1163   :  { %v1084_v40 = vmul.f32 0.5, %v1058_v21 }
0x1164   :  { %v1083_v41 = vmul.f32 0.5, %v1053_v38  ;;  %v1330_v42 = vpop.f32.mrb[14].mxu0 }
0x1165   :  { %1439 = vtanh.f32 %v1084_v40  ;;  %v1068_v43 = vadd.f32 %v1330_v42, %v1698_v61  ;;  %v1062_v44 = vpop.f32.mrb[15].mxu0 }
0x1166   :  { %1441 = vtanh.f32 %v1083_v41  ;;  %v1063_v45 = vadd.f32 %v1698_v61, %v1062_v44 }
0x1167   :  { %v1086_v46 = vmul.f32 0.5, %v1068_v43 }
0x1168   :  { %v1085_v47 = vmul.f32 0.5, %v1063_v45 }
0x1169   :  { %1443 = vtanh.f32 %v1086_v46 }
0x116a   :  { %1445 = vtanh.f32 %v1085_v47 }
0x116b   :  { %v1436_v48 = vpop.eup %1435  ;;  %1447 = vtanh.f32 %v840_v2 }
0x116c   :  { %v1438_v49 = vpop.eup %1437  ;;  %v1098_v50 = vadd.f32 1.0, %v1436_v48 }
0x116d   :  { %v1097_v51 = vadd.f32 1.0, %v1438_v49 }
0x116e   :  { %v1106_v52 = vmul.f32 0.5, %v1098_v50 }
0x116f   :  { %v1440_v53 = vpop.eup %1439  ;;  %v1105_v54 = vmul.f32 0.5, %v1097_v51 }
0x1170   :  { %v1442_v55 = vpop.eup %1441  ;;  %1114 = vst [vmem:[%s1752_s6 + $0x8] sm:$0xff] %v1106_v52  ;;  %v1100_v56 = vadd.f32 1.0, %v1440_v53 }
0x1171   :  { %1113 = vst [vmem:[%s1752_s6] sm:$0xff] %v1105_v54  ;;  %v1099_v57 = vadd.f32 1.0, %v1442_v55 }
0x1172   :  { %v1108_v16 = vmul.f32 0.5, %v1100_v56 }
0x1173   :  { %v1444_v58 = vpop.eup %1443  ;;  %v1107_v59 = vmul.f32 0.5, %v1099_v57 }
0x1174   :  { %v1446_v60 = vpop.eup %1445  ;;  %1116 = vst [vmem:[%s1752_s6 + $0x18] sm:$0xff] %v1108_v16  ;;  %v1102_v62 = vadd.f32 1.0, %v1444_v58 }
0x1175   :  { %1115 = vst [vmem:[%s1752_s6 + $0x10] sm:$0xff] %v1107_v59  ;;  %v1101_v63 = vadd.f32 1.0, %v1446_v60  ;;  %v1448_v3 = vpop.eup %1447 }
0x1176   :  { %v1110_v0 = vmul.f32 0.5, %v1102_v62  ;;  %v842_v6 = vadd.f32 1.0, %v1448_v3 }
0x1177   :  { %v1109_v1 = vmul.f32 0.5, %v1101_v63 }
0x1178   :  { %1118 = vst [vmem:[%s1752_s6 + $0x28] sm:$0xff] %v1110_v0  ;;  %v843_v4 = vmul.f32 0.5, %v842_v6 }
0x1179   :  { %1117 = vst [vmem:[%s1752_s6 + $0x20] sm:$0xff] %v1109_v1 }
0x117a   :  { %v845_v7 = vmul.f32 %v843_v4, %v1665_v9 }
0x11d4   :  { %v848_v5 = vpop.permute.xlu0 %847 }
0x11d5   :  { %v850_v14 = vmul.f32 %v848_v5, %v843_v4 }
0x11d7   :  { %852 = vrot.lane.b32.xlu1 %v850_v14, %s1465_s3 }
0x1249   :  { %v853_v8 = vpop.permute.xlu1 %852 }
0x124a   :  { %v855_v13 = vadd.f32 %v853_v8, %v845_v7 }
0x124c   :  { %1449 = vtanh.f32 %v855_v13 }
0x1256   :  { %v1450_v15 = vpop.eup %1449 }
0x1257   :  { %858 = vrot.lane.b32.xlu0 %v1450_v15, %s1464_s19 }
0x12c9   :  { %v859_v10 = vpop.permute.xlu0 %858 }
0x12ca   :  { %v861_v11 = vmul.f32 %v859_v10, %v843_v4 }
0x12cc   :  { %863 = vrot.lane.b32.xlu1 %v861_v11, %s1465_s3 }
0x133e   :  { %v864_v12 = vpop.permute.xlu1 %863 }
0x133f   :  { %1312 = vmatmul.mubr.msk.f32.vlgmr.msra.gmra.mrb[12].mxu1 %vm177_vm3, %v864_v12  ;;  %1331 = vmatprep.mubr.msk.f32.mxu0 %vm177_vm3, %v864_v12 }
0x1412   :  { %v933_v20 = vpop.f32.mrb[12].mxu1 }
0x1413   :  { %v937_v9 = vadd.f32 %v933_v20, %v170_v17  ;;  %v1313_v22 = vpop.f32.mrb[13].mxu1 }
0x1415   :  { %1451 = vtanh.f32 %v937_v9  ;;  %v938_v25 = vmul.f32 0.5, %v937_v9 }
0x1417   :  { %1453 = vtanh.f32 %v938_v25 }
0x141f   :  { %v1452_v23 = vpop.eup %1451 }
0x1420   :  { %945 = vrot.lane.b32.xlu0 %v1452_v23, %s1464_s19 }
0x1421   :  { %v1454_v26 = vpop.eup %1453 }
0x1422   :  { %v940_v27 = vadd.f32 1.0, %v1454_v26 }
0x1424   :  { %v941_v28 = vmul.f32 0.5, %v940_v27 }
0x1426   :  { %v943_v24 = vmul.f32 %v941_v28, %v855_v13 }
0x1492   :  { %v946_v39 = vpop.permute.xlu0 %945 }
0x1493   :  { %v948_v29 = vmul.f32 %v946_v39, %v941_v28 }
0x1495   :  { %950 = vrot.lane.b32.xlu1 %v948_v29, %s1465_s3 }
0x1507   :  { %v951_v30 = vpop.permute.xlu1 %950 }
0x1508   :  { %v953_v31 = vadd.f32 %v951_v30, %v943_v24 }
0x150a   :  { %1455 = vtanh.f32 %v953_v31 }
0x1514   :  { %v1456_v18 = vpop.eup %1455 }
0x1515   :  { %956 = vrot.lane.b32.xlu0 %v1456_v18, %s1464_s19 }
0x1587   :  { %v957_v19 = vpop.permute.xlu0 %956 }
0x1588   :  { %v959_v32 = vmul.f32 %v957_v19, %v941_v28 }
0x158a   :  { %972 = vrot.lane.b32.xlu1 %v959_v32, %s1465_s3 }
0x15fc   :  { %v973_v33 = vpop.permute.xlu1 %972 }
0x15fd   :  { %1332 = vmatmul.mubr.msk.f32.gmra.mrb[16].mxu0 %vm177_vm3, %v973_v33 }
0x16d0   :  { %v1333_v34 = vpop.f32.mrb[16].mxu0 }
0x16d1   :  { %v1078_v35 = vadd.f32 %v1333_v34, %v1698_v61  ;;  %v1072_v36 = vpop.f32.mrb[17].mxu0 }
0x16d2   :  { %v1073_v21 = vadd.f32 %v1698_v61, %v1072_v36 }
0x16d3   :  { %v1088_v37 = vmul.f32 0.5, %v1078_v35 }
0x16d4   :  { %v1087_v38 = vmul.f32 0.5, %v1073_v21 }
0x16d5   :  { %1457 = vtanh.f32 %v1088_v37 }
0x16d6   :  { %1459 = vtanh.f32 %v1087_v38 }
0x16df   :  { %v1458_v40 = vpop.eup %1457 }
0x16e0   :  { %v1460_v41 = vpop.eup %1459  ;;  %v1104_v42 = vadd.f32 1.0, %v1458_v40 }
0x16e1   :  { %v1103_v43 = vadd.f32 1.0, %v1460_v41 }
0x16e2   :  { %v1112_v44 = vmul.f32 0.5, %v1104_v42 }
0x16e3   :  { %v1111_v45 = vmul.f32 0.5, %v1103_v43 }
0x16e4   :  { %1120 = vst [vmem:[%s1752_s6 + $0x38] sm:$0xff] %v1112_v44 }
0x16e5   :  { %1119 = vst [vmem:[%s1752_s6 + $0x30] sm:$0xff] %v1111_v45 }

</bundles_post_ra>
